<compile_context>
chip_gen: v5e
topology: v5e:2x2
jax: 0.10.0
libtpu: 0.0.40
codegen_flags: <defaults>
</compile_context>

<pallas_src>
import jax
import jax.numpy as jnp
from jax.experimental import pallas as pl
from jax.experimental.pallas import tpu as pltpu


# Feature sizes of the PyTorch module: input_dim -> 512 -> 256 -> 128 -> 64 -> 32 -> 16 -> 3
HIDDEN_DIMS = [512, 256, 128, 64, 32, 16]
OUT_DIM = 3
OUT_PAD = 128          # lane-dense padded output width
BN_EPS = 1e-5


def _round_up(n, m):
    return ((n + m - 1) // m) * m


def _mlp_kernel(*refs):
    """refs = [x, (w, b) * 7, out].  w are bf16 (in, out); b are f32 (1, out)."""
    x_ref = refs[0]
    out_ref = refs[-1]
    params = refs[1:-1]
    n_layers = len(params) // 2

    h = x_ref[...]                                           # bf16 (block_b, F)

    # Six Linear(+folded BN) -> ReLU blocks.  Dropout(eval) is identity.
    for li in range(n_layers - 1):
        w_ref, b_ref = params[2 * li], params[2 * li + 1]
        acc = jnp.dot(h, w_ref[...], preferred_element_type=jnp.float32)  # MXU, f32 acc
        acc = acc + b_ref[...]                               # f32 epilogue (bias incl. BN shift)
        acc = jnp.maximum(acc, 0.0)                          # ReLU
        h = acc.astype(jnp.bfloat16)                         # back to bf16 for next MXU pass

    # Final Linear(16 -> 3, padded to 128 lanes), no BN / activation.
    w_ref, b_ref = params[-2], params[-1]
    out = jnp.dot(h, w_ref[...], preferred_element_type=jnp.float32) + b_ref[...]
    out_ref[...] = out.astype(out_ref.dtype)


def prepare_params(params):
    """Fold BN running stats into (W, b) once, cast weights to bf16, pad fc7 to 128 lanes.

    Input `params` uses the raw-module convention: w{i} pre-transposed to (in, out), b{i},
    and bn{i}_{gamma,beta,mean,var} for i in 1..6.  Call this ONCE and reuse the result.
    """
    prepared = []
    for li in range(1, len(HIDDEN_DIMS) + 1):
        w = params[f"w{li}"]                                  # (in, out)
        b = params[f"b{li}"]
        gamma = params[f"bn{li}_gamma"]
        beta = params[f"bn{li}_beta"]
        mean = params[f"bn{li}_mean"]
        var = params[f"bn{li}_var"]
        scale = gamma / jnp.sqrt(var + BN_EPS)                # per-output-feature
        w_f = (w * scale[None, :]).astype(jnp.bfloat16)       # fold BN scale into columns of W
        b_f = ((b - mean) * scale + beta).reshape(1, -1).astype(jnp.float32)
        prepared += [w_f, b_f]

    # fc7: zero-pad output dim 3 -> 128 for lane-dense stores.
    w7 = params["w7"]                                         # (16, 3)
    b7 = params["b7"]                                         # (3,)
    w7p = jnp.zeros((w7.shape[0], OUT_PAD), jnp.float32).at[:, :OUT_DIM].set(w7)
    b7p = jnp.zeros((1, OUT_PAD), jnp.float32).at[0, :OUT_DIM].set(b7)
    prepared += [w7p.astype(jnp.bfloat16), b7p]
    return prepared


def classification_nn_trend_forward(x, prepared_params, *, block_b=512):
    """Fused MLP forward.  x: (B, input_dim) f32.  prepared_params: output of prepare_params()."""
    B, F = x.shape

    # Batch tile: whole (8-rounded) batch if small, otherwise a fixed 16-multiple tile.
    if B <= block_b:
        bb = _round_up(max(B, 1), 8)
    else:
        bb = _round_up(block_b, 16)
    B_pad = _round_up(B, bb)

    x_pad = x if B_pad == B else jnp.pad(x, ((0, B_pad - B), (0, 0)))
    x_bf16 = x_pad.astype(jnp.bfloat16)

    kernel_args = [x_bf16] + list(prepared_params)

    def full_spec(arr):
        nd = arr.ndim
        return pl.BlockSpec(arr.shape, lambda i, _nd=nd: (0,) * _nd)

    in_specs = [pl.BlockSpec((bb, F), lambda i: (i, 0))]
    in_specs += [full_spec(arr) for arr in prepared_params]

    # Advisory cost estimate for XLA's scheduler.
    dims = [F] + HIDDEN_DIMS + [OUT_PAD]
    flops = 2 * B_pad * sum(dims[i] * dims[i + 1] for i in range(len(dims) - 1))
    bytes_accessed = (
        x_bf16.size * x_bf16.dtype.itemsize
        + sum(a.size * a.dtype.itemsize for a in prepared_params)
        + B_pad * OUT_PAD * 4
    )

    out = pl.pallas_call(
        _mlp_kernel,
        out_shape=jax.ShapeDtypeStruct((B_pad, OUT_PAD), jnp.float32),
        grid_spec=pltpu.PrefetchScalarGridSpec(
            num_scalar_prefetch=0,
            grid=(B_pad // bb,),
            in_specs=in_specs,
            out_specs=pl.BlockSpec((bb, OUT_PAD), lambda i: (i, 0)),
        ),
        compiler_params=pltpu.CompilerParams(
            dimension_semantics=("parallel",),
        ),
        cost_estimate=pl.CostEstimate(
            flops=flops, transcendentals=0, bytes_accessed=bytes_accessed
        ),
    )(*kernel_args)

    return out[:B, :OUT_DIM]


def init_params(input_dim, key):
    """Deterministic synthetic parameters matching the PyTorch module's shapes."""
    dims = [input_dim] + HIDDEN_DIMS + [OUT_DIM]
    params = {}
    for li in range(1, len(dims)):
        d_in, d_out = dims[li - 1], dims[li]
        key, kw, kb = jax.random.split(key, 3)
        # nn.Linear stores weight as (out, in); keep that convention then transpose.
        w_oi = jax.random.normal(kw, (d_out, d_in), jnp.float32) * 0.05
        b = jax.random.normal(kb, (d_out,), jnp.float32) * 0.05
        params[f"w{li}"] = w_oi.T          # (in, out) for kernel-side h @ W
        params[f"b{li}"] = b
        if li <= len(HIDDEN_DIMS):         # BN on the first six layers only
            key, kg, kbt, km, kv = jax.random.split(key, 5)
            params[f"bn{li}_gamma"] = 1.0 + 0.1 * jax.random.normal(kg, (d_out,), jnp.float32)
            params[f"bn{li}_beta"] = 0.1 * jax.random.normal(kbt, (d_out,), jnp.float32)
            params[f"bn{li}_mean"] = 0.1 * jax.random.normal(km, (d_out,), jnp.float32)
            params[f"bn{li}_var"] = jnp.abs(jax.random.normal(kv, (d_out,), jnp.float32)) + 0.5
    return params


def reference_forward_f32(x, params):
    """Plain-JAX f32 reference matching eval-mode PyTorch semantics."""
    h = x.astype(jnp.float32)
    for li in range(1, len(HIDDEN_DIMS) + 1):
        h = h @ params[f"w{li}"] + params[f"b{li}"]
        scale = params[f"bn{li}_gamma"] / jnp.sqrt(params[f"bn{li}_var"] + BN_EPS)
        h = (h - params[f"bn{li}_mean"]) * scale + params[f"bn{li}_beta"]
        h = jnp.maximum(h, 0.0)
        # dropout(eval) == identity
    return h @ params["w7"] + params["b7"]


def reference_forward_bf16(x, prepared_params):
    """Plain-JAX reference mirroring the kernel's bf16-matmul / f32-accumulate arithmetic."""
    h = x.astype(jnp.bfloat16)
    n_layers = len(prepared_params) // 2
    for li in range(n_layers - 1):
        w, b = prepared_params[2 * li], prepared_params[2 * li + 1]
        acc = jnp.dot(h, w, preferred_element_type=jnp.float32) + b
        h = jnp.maximum(acc, 0.0).astype(jnp.bfloat16)
    w, b = prepared_params[-2], prepared_params[-1]
    out = jnp.dot(h, w, preferred_element_type=jnp.float32) + b
    return out[:, :OUT_DIM]


if __name__ == "__main__":
    INPUT_DIM = 32
    BATCH = 8

    key = jax.random.PRNGKey(0)
    key, kx = jax.random.split(key)
    x = jax.random.normal(kx, (BATCH, INPUT_DIM), jnp.float32)
    params = init_params(INPUT_DIM, key)

    prepared = prepare_params(params)           # fold BN + bf16 cast ONCE
    out = classification_nn_trend_forward(x, prepared)
    out = jax.block_until_ready(out)
    assert out.shape == (BATCH, OUT_DIM)

    # Tight check against a reference with identical bf16-matmul arithmetic.
    ref_bf16 = reference_forward_bf16(x, prepared)
    assert jnp.allclose(out, ref_bf16, atol=2e-3, rtol=2e-3), "mismatch vs bf16-mirror reference"

    # Loose check against the exact f32 eval-mode PyTorch semantics (bf16 matmul chain noise).
    ref_f32 = reference_forward_f32(x, params)
    assert jnp.allclose(out, ref_f32, atol=5e-2, rtol=5e-2), "mismatch vs f32 reference"

    print("KERNEL_OK")
</pallas_src>

<mosaic_0001>
module attributes {stable_mosaic.version = 11 : i64} {
  func.func @_mlp_kernel(%arg0: i32, %arg1: memref<8x32xbf16, #tpu.memory_space<vmem>>, %arg2: memref<32x512xbf16, #tpu.memory_space<vmem>>, %arg3: memref<1x512xf32, #tpu.memory_space<vmem>>, %arg4: memref<512x256xbf16, #tpu.memory_space<vmem>>, %arg5: memref<1x256xf32, #tpu.memory_space<vmem>>, %arg6: memref<256x128xbf16, #tpu.memory_space<vmem>>, %arg7: memref<1x128xf32, #tpu.memory_space<vmem>>, %arg8: memref<128x64xbf16, #tpu.memory_space<vmem>>, %arg9: memref<1x64xf32, #tpu.memory_space<vmem>>, %arg10: memref<64x32xbf16, #tpu.memory_space<vmem>>, %arg11: memref<1x32xf32, #tpu.memory_space<vmem>>, %arg12: memref<32x16xbf16, #tpu.memory_space<vmem>>, %arg13: memref<1x16xf32, #tpu.memory_space<vmem>>, %arg14: memref<16x128xbf16, #tpu.memory_space<vmem>>, %arg15: memref<1x128xf32, #tpu.memory_space<vmem>>, %arg16: memref<8x128xf32, #tpu.memory_space<vmem>>) attributes {dimension_semantics = [#tpu.dimension_semantics<parallel>], iteration_bounds = array<i64: 1>, scalar_prefetch = 0 : i64, scratch_operands = 0 : i64, tpu.core_type = #tpu.core_type<tc>, window_params = [{transform_indices = @transform_0, window_bounds = array<i64: 8, 32>}, {pipeline_mode = #tpu.pipeline_mode<synchronous>, transform_indices = @transform_1, window_bounds = array<i64: 32, 512>}, {pipeline_mode = #tpu.pipeline_mode<synchronous>, transform_indices = @transform_2, window_bounds = array<i64: 1, 512>}, {pipeline_mode = #tpu.pipeline_mode<synchronous>, transform_indices = @transform_3, window_bounds = array<i64: 512, 256>}, {pipeline_mode = #tpu.pipeline_mode<synchronous>, transform_indices = @transform_4, window_bounds = array<i64: 1, 256>}, {pipeline_mode = #tpu.pipeline_mode<synchronous>, transform_indices = @transform_5, window_bounds = array<i64: 256, 128>}, {pipeline_mode = #tpu.pipeline_mode<synchronous>, transform_indices = @transform_6, window_bounds = array<i64: 1, 128>}, {pipeline_mode = #tpu.pipeline_mode<synchronous>, transform_indices = @transform_7, window_bounds = array<i64: 128, 64>}, {pipeline_mode = #tpu.pipeline_mode<synchronous>, transform_indices = @transform_8, window_bounds = array<i64: 1, 64>}, {pipeline_mode = #tpu.pipeline_mode<synchronous>, transform_indices = @transform_9, window_bounds = array<i64: 64, 32>}, {pipeline_mode = #tpu.pipeline_mode<synchronous>, transform_indices = @transform_10, window_bounds = array<i64: 1, 32>}, {pipeline_mode = #tpu.pipeline_mode<synchronous>, transform_indices = @transform_11, window_bounds = array<i64: 32, 16>}, {pipeline_mode = #tpu.pipeline_mode<synchronous>, transform_indices = @transform_12, window_bounds = array<i64: 1, 16>}, {pipeline_mode = #tpu.pipeline_mode<synchronous>, transform_indices = @transform_13, window_bounds = array<i64: 16, 128>}, {pipeline_mode = #tpu.pipeline_mode<synchronous>, transform_indices = @transform_14, window_bounds = array<i64: 1, 128>}, {transform_indices = @transform_15, window_bounds = array<i64: 8, 128>}]} {
    %c0 = arith.constant 0 : index
    %c0_0 = arith.constant 0 : index
    %0 = vector.load %arg1[%c0, %c0_0] : memref<8x32xbf16, #tpu.memory_space<vmem>>, vector<8x32xbf16>
    %c0_1 = arith.constant 0 : index
    %c0_2 = arith.constant 0 : index
    %1 = vector.load %arg2[%c0_1, %c0_2] : memref<32x512xbf16, #tpu.memory_space<vmem>>, vector<32x512xbf16>
    %cst = arith.constant dense<0.000000e+00> : vector<8x512xf32>
    %2 = tpu.matmul %0, %1, %cst {dimension_numbers = #tpu.dot_dimension_numbers<[1], [0], [0], [1], [0, 0, 1, 1], [], []>} : vector<8x32xbf16>, vector<32x512xbf16>, vector<8x512xf32> -> vector<8x512xf32>
    %c0_3 = arith.constant 0 : index
    %c0_4 = arith.constant 0 : index
    %3 = vector.load %arg3[%c0_3, %c0_4] : memref<1x512xf32, #tpu.memory_space<vmem>>, vector<1x512xf32>
    %4 = vector.broadcast %3 : vector<1x512xf32> to vector<8x512xf32>
    %5 = arith.addf %2, %4 : vector<8x512xf32>
    %cst_5 = arith.constant 0.000000e+00 : f32
    %6 = vector.broadcast %cst_5 : f32 to vector<8x512xf32>
    %7 = arith.maximumf %5, %6 : vector<8x512xf32>
    %8 = arith.truncf %7 : vector<8x512xf32> to vector<8x512xbf16>
    %c0_6 = arith.constant 0 : index
    %c0_7 = arith.constant 0 : index
    %9 = vector.load %arg4[%c0_6, %c0_7] : memref<512x256xbf16, #tpu.memory_space<vmem>>, vector<512x256xbf16>
    %cst_8 = arith.constant dense<0.000000e+00> : vector<8x256xf32>
    %10 = tpu.matmul %8, %9, %cst_8 {dimension_numbers = #tpu.dot_dimension_numbers<[1], [0], [0], [1], [0, 0, 1, 1], [], []>} : vector<8x512xbf16>, vector<512x256xbf16>, vector<8x256xf32> -> vector<8x256xf32>
    %c0_9 = arith.constant 0 : index
    %c0_10 = arith.constant 0 : index
    %11 = vector.load %arg5[%c0_9, %c0_10] : memref<1x256xf32, #tpu.memory_space<vmem>>, vector<1x256xf32>
    %12 = vector.broadcast %11 : vector<1x256xf32> to vector<8x256xf32>
    %13 = arith.addf %10, %12 : vector<8x256xf32>
    %cst_11 = arith.constant 0.000000e+00 : f32
    %14 = vector.broadcast %cst_11 : f32 to vector<8x256xf32>
    %15 = arith.maximumf %13, %14 : vector<8x256xf32>
    %16 = arith.truncf %15 : vector<8x256xf32> to vector<8x256xbf16>
    %c0_12 = arith.constant 0 : index
    %c0_13 = arith.constant 0 : index
    %17 = vector.load %arg6[%c0_12, %c0_13] : memref<256x128xbf16, #tpu.memory_space<vmem>>, vector<256x128xbf16>
    %cst_14 = arith.constant dense<0.000000e+00> : vector<8x128xf32>
    %18 = tpu.matmul %16, %17, %cst_14 {dimension_numbers = #tpu.dot_dimension_numbers<[1], [0], [0], [1], [0, 0, 1, 1], [], []>} : vector<8x256xbf16>, vector<256x128xbf16>, vector<8x128xf32> -> vector<8x128xf32>
    %c0_15 = arith.constant 0 : index
    %c0_16 = arith.constant 0 : index
    %19 = vector.load %arg7[%c0_15, %c0_16] : memref<1x128xf32, #tpu.memory_space<vmem>>, vector<1x128xf32>
    %20 = vector.broadcast %19 : vector<1x128xf32> to vector<8x128xf32>
    %21 = arith.addf %18, %20 : vector<8x128xf32>
    %cst_17 = arith.constant 0.000000e+00 : f32
    %22 = vector.broadcast %cst_17 : f32 to vector<8x128xf32>
    %23 = arith.maximumf %21, %22 : vector<8x128xf32>
    %24 = arith.truncf %23 : vector<8x128xf32> to vector<8x128xbf16>
    %c0_18 = arith.constant 0 : index
    %c0_19 = arith.constant 0 : index
    %25 = vector.load %arg8[%c0_18, %c0_19] : memref<128x64xbf16, #tpu.memory_space<vmem>>, vector<128x64xbf16>
    %cst_20 = arith.constant dense<0.000000e+00> : vector<8x64xf32>
    %26 = tpu.matmul %24, %25, %cst_20 {dimension_numbers = #tpu.dot_dimension_numbers<[1], [0], [0], [1], [0, 0, 1, 1], [], []>} : vector<8x128xbf16>, vector<128x64xbf16>, vector<8x64xf32> -> vector<8x64xf32>
    %c0_21 = arith.constant 0 : index
    %c0_22 = arith.constant 0 : index
    %27 = vector.load %arg9[%c0_21, %c0_22] : memref<1x64xf32, #tpu.memory_space<vmem>>, vector<1x64xf32>
    %28 = vector.broadcast %27 : vector<1x64xf32> to vector<8x64xf32>
    %29 = arith.addf %26, %28 : vector<8x64xf32>
    %cst_23 = arith.constant 0.000000e+00 : f32
    %30 = vector.broadcast %cst_23 : f32 to vector<8x64xf32>
    %31 = arith.maximumf %29, %30 : vector<8x64xf32>
    %32 = arith.truncf %31 : vector<8x64xf32> to vector<8x64xbf16>
    %c0_24 = arith.constant 0 : index
    %c0_25 = arith.constant 0 : index
    %33 = vector.load %arg10[%c0_24, %c0_25] : memref<64x32xbf16, #tpu.memory_space<vmem>>, vector<64x32xbf16>
    %cst_26 = arith.constant dense<0.000000e+00> : vector<8x32xf32>
    %34 = tpu.matmul %32, %33, %cst_26 {dimension_numbers = #tpu.dot_dimension_numbers<[1], [0], [0], [1], [0, 0, 1, 1], [], []>} : vector<8x64xbf16>, vector<64x32xbf16>, vector<8x32xf32> -> vector<8x32xf32>
    %c0_27 = arith.constant 0 : index
    %c0_28 = arith.constant 0 : index
    %35 = vector.load %arg11[%c0_27, %c0_28] : memref<1x32xf32, #tpu.memory_space<vmem>>, vector<1x32xf32>
    %36 = vector.broadcast %35 : vector<1x32xf32> to vector<8x32xf32>
    %37 = arith.addf %34, %36 : vector<8x32xf32>
    %cst_29 = arith.constant 0.000000e+00 : f32
    %38 = vector.broadcast %cst_29 : f32 to vector<8x32xf32>
    %39 = arith.maximumf %37, %38 : vector<8x32xf32>
    %40 = arith.truncf %39 : vector<8x32xf32> to vector<8x32xbf16>
    %c0_30 = arith.constant 0 : index
    %c0_31 = arith.constant 0 : index
    %41 = vector.load %arg12[%c0_30, %c0_31] : memref<32x16xbf16, #tpu.memory_space<vmem>>, vector<32x16xbf16>
    %cst_32 = arith.constant dense<0.000000e+00> : vector<8x16xf32>
    %42 = tpu.matmul %40, %41, %cst_32 {dimension_numbers = #tpu.dot_dimension_numbers<[1], [0], [0], [1], [0, 0, 1, 1], [], []>} : vector<8x32xbf16>, vector<32x16xbf16>, vector<8x16xf32> -> vector<8x16xf32>
    %c0_33 = arith.constant 0 : index
    %c0_34 = arith.constant 0 : index
    %43 = vector.load %arg13[%c0_33, %c0_34] : memref<1x16xf32, #tpu.memory_space<vmem>>, vector<1x16xf32>
    %44 = vector.broadcast %43 : vector<1x16xf32> to vector<8x16xf32>
    %45 = arith.addf %42, %44 : vector<8x16xf32>
    %cst_35 = arith.constant 0.000000e+00 : f32
    %46 = vector.broadcast %cst_35 : f32 to vector<8x16xf32>
    %47 = arith.maximumf %45, %46 : vector<8x16xf32>
    %48 = arith.truncf %47 : vector<8x16xf32> to vector<8x16xbf16>
    %c0_36 = arith.constant 0 : index
    %c0_37 = arith.constant 0 : index
    %49 = vector.load %arg14[%c0_36, %c0_37] : memref<16x128xbf16, #tpu.memory_space<vmem>>, vector<16x128xbf16>
    %cst_38 = arith.constant dense<0.000000e+00> : vector<8x128xf32>
    %50 = tpu.matmul %48, %49, %cst_38 {dimension_numbers = #tpu.dot_dimension_numbers<[1], [0], [0], [1], [0, 0, 1, 1], [], []>} : vector<8x16xbf16>, vector<16x128xbf16>, vector<8x128xf32> -> vector<8x128xf32>
    %c0_39 = arith.constant 0 : index
    %c0_40 = arith.constant 0 : index
    %51 = vector.load %arg15[%c0_39, %c0_40] : memref<1x128xf32, #tpu.memory_space<vmem>>, vector<1x128xf32>
    %52 = vector.broadcast %51 : vector<1x128xf32> to vector<8x128xf32>
    %53 = arith.addf %50, %52 : vector<8x128xf32>
    %c0_41 = arith.constant 0 : index
    %c0_42 = arith.constant 0 : index
    %54 = vector.load %arg16[%c0_41, %c0_42] : memref<8x128xf32, #tpu.memory_space<vmem>>, vector<8x128xf32>
    tpu.vector_store %arg16[%c0_41, %c0_42], %53 {strides = array<i32>} : memref<8x128xf32, #tpu.memory_space<vmem>>, vector<8x128xf32>,
    return
  }
  func.func @transform_0(%arg0: i32) -> (i32, i32) {
    %c0_i32 = arith.constant 0 : i32
    %c0_i32_0 = arith.constant 0 : i32
    return %arg0, %c0_i32 : i32, i32
  }
  func.func @transform_1(%arg0: i32) -> (i32, i32) {
    %c0_i32 = arith.constant 0 : i32
    %c0_i32_0 = arith.constant 0 : i32
    %c0_i32_1 = arith.constant 0 : i32
    return %c0_i32, %c0_i32_0 : i32, i32
  }
  func.func @transform_2(%arg0: i32) -> (i32, i32) {
    %c0_i32 = arith.constant 0 : i32
    %c0_i32_0 = arith.constant 0 : i32
    %c0_i32_1 = arith.constant 0 : i32
    return %c0_i32, %c0_i32_0 : i32, i32
  }
  func.func @transform_3(%arg0: i32) -> (i32, i32) {
    %c0_i32 = arith.constant 0 : i32
    %c0_i32_0 = arith.constant 0 : i32
    %c0_i32_1 = arith.constant 0 : i32
    return %c0_i32, %c0_i32_0 : i32, i32
  }
  func.func @transform_4(%arg0: i32) -> (i32, i32) {
    %c0_i32 = arith.constant 0 : i32
    %c0_i32_0 = arith.constant 0 : i32
    %c0_i32_1 = arith.constant 0 : i32
    return %c0_i32, %c0_i32_0 : i32, i32
  }
  func.func @transform_5(%arg0: i32) -> (i32, i32) {
    %c0_i32 = arith.constant 0 : i32
    %c0_i32_0 = arith.constant 0 : i32
    %c0_i32_1 = arith.constant 0 : i32
    return %c0_i32, %c0_i32_0 : i32, i32
  }
  func.func @transform_6(%arg0: i32) -> (i32, i32) {
    %c0_i32 = arith.constant 0 : i32
    %c0_i32_0 = arith.constant 0 : i32
    %c0_i32_1 = arith.constant 0 : i32
    return %c0_i32, %c0_i32_0 : i32, i32
  }
  func.func @transform_7(%arg0: i32) -> (i32, i32) {
    %c0_i32 = arith.constant 0 : i32
    %c0_i32_0 = arith.constant 0 : i32
    %c0_i32_1 = arith.constant 0 : i32
    return %c0_i32, %c0_i32_0 : i32, i32
  }
  func.func @transform_8(%arg0: i32) -> (i32, i32) {
    %c0_i32 = arith.constant 0 : i32
    %c0_i32_0 = arith.constant 0 : i32
    %c0_i32_1 = arith.constant 0 : i32
    return %c0_i32, %c0_i32_0 : i32, i32
  }
  func.func @transform_9(%arg0: i32) -> (i32, i32) {
    %c0_i32 = arith.constant 0 : i32
    %c0_i32_0 = arith.constant 0 : i32
    %c0_i32_1 = arith.constant 0 : i32
    return %c0_i32, %c0_i32_0 : i32, i32
  }
  func.func @transform_10(%arg0: i32) -> (i32, i32) {
    %c0_i32 = arith.constant 0 : i32
    %c0_i32_0 = arith.constant 0 : i32
    %c0_i32_1 = arith.constant 0 : i32
    return %c0_i32, %c0_i32_0 : i32, i32
  }
  func.func @transform_11(%arg0: i32) -> (i32, i32) {
    %c0_i32 = arith.constant 0 : i32
    %c0_i32_0 = arith.constant 0 : i32
    %c0_i32_1 = arith.constant 0 : i32
    return %c0_i32, %c0_i32_0 : i32, i32
  }
  func.func @transform_12(%arg0: i32) -> (i32, i32) {
    %c0_i32 = arith.constant 0 : i32
    %c0_i32_0 = arith.constant 0 : i32
    %c0_i32_1 = arith.constant 0 : i32
    return %c0_i32, %c0_i32_0 : i32, i32
  }
  func.func @transform_13(%arg0: i32) -> (i32, i32) {
    %c0_i32 = arith.constant 0 : i32
    %c0_i32_0 = arith.constant 0 : i32
    %c0_i32_1 = arith.constant 0 : i32
    return %c0_i32, %c0_i32_0 : i32, i32
  }
  func.func @transform_14(%arg0: i32) -> (i32, i32) {
    %c0_i32 = arith.constant 0 : i32
    %c0_i32_0 = arith.constant 0 : i32
    %c0_i32_1 = arith.constant 0 : i32
    return %c0_i32, %c0_i32_0 : i32, i32
  }
  func.func @transform_15(%arg0: i32) -> (i32, i32) {
    %c0_i32 = arith.constant 0 : i32
    %c0_i32_0 = arith.constant 0 : i32
    return %arg0, %c0_i32 : i32, i32
  }
}

</mosaic_0001>

<bundles_post_ra>
// kernel: tpu_custom_call.1
= control target key start
LH: loop header
LB: loop body
LE: loop exit
PB: predicated region body
PF: predicated region fallthrough
CT: control target
= control target key end

     0   :  { %20 = vsyncpa [#allocation3], 0  ;;  %s2171_s0 = inlined_call_operand.hbm [shape: bf16[8,32], index: 0, kind: input, shape index: {}]   ;;  %s2172_s1 = inlined_call_operand.hbm [shape: bf16[32,512], index: 1, kind: input, shape index: {}]   ;;  %s2173_s2 = inlined_call_operand.hbm [shape: f32[1,512], index: 2, kind: input, shape index: {}]   ;;  %s2174_s3 = inlined_call_operand.hbm [shape: bf16[512,256], index: 3, kind: input, shape index: {}]   ;;  %s2175_s4 = inlined_call_operand.hbm [shape: f32[1,256], index: 4, kind: input, shape index: {}]   ;;  %s2176_s5 = inlined_call_operand.vmem [shape: bf16[256,128], index: 5, kind: input, shape index: {}]   ;;  %s2177_s6 = inlined_call_operand.hbm [shape: f32[1,128], index: 6, kind: input, shape index: {}]   ;;  %s2178_s7 = inlined_call_operand.vmem [shape: bf16[128,64], index: 7, kind: input, shape index: {}]   ;;  %s2179_s8 = inlined_call_operand.hbm [shape: f32[1,64], index: 8, kind: input, shape index: {}]   ;;  %s2180_s9 = inlined_call_operand.vmem [shape: bf16[64,32], index: 9, kind: input, shape index: {}]   ;;  %s2181_s10 = inlined_call_operand.vmem [shape: f32[1,32], index: 10, kind: input, shape index: {}]   ;;  %s2182_s11 = inlined_call_operand.vmem [shape: bf16[32,16], index: 11, kind: input, shape index: {}]   ;;  %s2183_s12 = inlined_call_operand.vmem [shape: f32[1,16], index: 12, kind: input, shape index: {}]   ;;  %s2184_s13 = inlined_call_operand.hbm [shape: bf16[16,128], index: 13, kind: input, shape index: {}]   ;;  %s2185_s14 = inlined_call_operand.vmem [shape: f32[1,128], index: 14, kind: input, shape index: {}]   ;;  %s2186_s15 = inlined_call_operand.hbm [shape: f32[8,128], index: 15, kind: output, shape index: {}]  }
   0x1   :  { %21 = vsyncpa [#allocation6], 0 }
   0x2   :  { %22 = vsyncpa [#allocation9], 0 }
   0x3   :  { %23 = vsyncpa [#allocation12], 0 }
   0x4   :  { %24 = vsyncpa [#allocation15], 0  ;;  %s41_s20 = sshll.u32 %s2172_s1, 4  ;;  %s42_s20 = int_to_ptr.hbm [resolvable:$true] %s41_s20 }
   0x5   :  { %25 = vsyncpa [#allocation4], 0  ;;  %s1945_s21 = smov [#allocation5]   ;;  %s65_s25 = sshll.u32 %s2174_s3, 4  ;;  %s66_s25 = int_to_ptr.hbm [resolvable:$true] %s65_s25 }
   0x6   :  { %s43_s22 = sshll.u32 %s1945_s21, 4  ;;  %s1946_s26 = smov 256   ;;  %s44_s22 = int_to_ptr.vmem [resolvable:$true] %s43_s22 }
   0x7   :  { %s1947_s27 = smov 16   ;;  %s1948_s28 = smov [#allocation8]  }
   0x8   :  { %49 = dma.hbm_to_vmem [thread:$0]  %s42_s20, 1024, %s44_s22, [#allocation6], %s1946_s26, %s1946_s26, %s1947_s27  }
   0x9   :  { %s67_s29 = sshll.u32 %s1948_s28, 4  ;;  %s1949_s30 = smov 128   ;;  %s68_s29 = int_to_ptr.vmem [resolvable:$true] %s67_s29 }
   0xa   :  { %s1950_s16 = smov 8   ;;  %s92_s18 = sshll.u32 %s2177_s6, 4  ;;  %s93_s18 = int_to_ptr.hbm [resolvable:$true] %s92_s18 }
   0xb   :  { %73 = dma.hbm_to_vmem [thread:$0]  %s66_s25, 8192, %s68_s29, [#allocation9], %s1949_s30, %s1949_s30, %s1950_s16  }
   0xc   :  { %s1951_s19 = smov [#allocation11]   ;;  %s31_s24 = sshll.u32 %s2171_s0, 4  ;;  %s32_s24 = int_to_ptr.hbm [resolvable:$true] %s31_s24 }
   0xd   :  { %s94_s21 = sshll.u32 %s1951_s19, 4  ;;  %s1952_s20 = smov [#allocation2]   ;;  %s95_s21 = int_to_ptr.vmem [resolvable:$true] %s94_s21 }
   0xe   :  { %97 = dma.hbm_to_vmem [thread:$0]  %s93_s18, 16, %s95_s21, [#allocation12]  }
   0xf   :  { %s33_s22 = sshll.u32 %s1952_s20, 4  ;;  %s55_s25 = sshll.u32 %s2173_s2, 4  ;;  %s34_s22 = int_to_ptr.vmem [resolvable:$true] %s33_s22  ;;  %s56_s25 = int_to_ptr.hbm [resolvable:$true] %s55_s25 }
  0x10   :  { %36 = dma.hbm_to_vmem [thread:$0]  %s32_s24, 64, %s34_s22, [#allocation3]  }
  0x11   :  { %s79_s29 = sshll.u32 %s2175_s4, 4  ;;  %s1953_s30 = smov [#allocation7]   ;;  %s80_s29 = int_to_ptr.hbm [resolvable:$true] %s79_s29 }
  0x12   :  { %s57_s16 = sshll.u32 %s1953_s30, 4  ;;  %s1954_s0 = smov [#allocation10]   ;;  %s58_s16 = int_to_ptr.vmem [resolvable:$true] %s57_s16 }
  0x13   :  { %60 = dma.hbm_to_vmem [thread:$0]  %s56_s25, 64, %s58_s16, [#allocation6]  }
  0x14   :  { %s81_s1 = sshll.u32 %s1954_s0, 4  ;;  %s105_s19 = sshll.u32 %s2179_s8, 4  ;;  %s82_s1 = int_to_ptr.vmem [resolvable:$true] %s81_s1  ;;  %s106_s19 = int_to_ptr.hbm [resolvable:$true] %s105_s19 }
  0x15   :  { %84 = dma.hbm_to_vmem [thread:$0]  %s80_s29, 32, %s82_s1, [#allocation9]  }
  0x16   :  { %s123_s23 = sshll.u32 %s2184_s13, 4  ;;  %s1955_s3 = smov [#allocation13]   ;;  %s124_s23 = int_to_ptr.hbm [resolvable:$true] %s123_s23 }
  0x17   :  { %s107_s4 = sshll.u32 %s1955_s3, 4  ;;  %s1956_s24 = smov [#allocation14]   ;;  %s108_s4 = int_to_ptr.vmem [resolvable:$true] %s107_s4 }
  0x18   :  { %110 = dma.hbm_to_vmem [thread:$0]  %s106_s19, 16, %s108_s4, [#allocation12]  }
  0x19   :  { %s125_s20 = sshll.u32 %s1956_s24, 4  ;;  %s1957_s22 = smov 64   ;;  %s126_s20 = int_to_ptr.vmem [resolvable:$true] %s125_s20 }
  0x1a   :  { %s1958_s26 = smov 4  }
  0x1b   :  { %131 = dma.hbm_to_vmem [thread:$0]  %s124_s23, 128, %s126_s20, [#allocation15], %s1957_s22, %s1957_s22, %s1958_s26  }
  0x1c   :  { %1933 = dma.done.wait [#allocation3], 64  }
  0x1d   :  { %1934 = vsyncadd [#allocation3], 4294967232 }
  0x1e   :  { %1935 = dma.done.wait [#allocation6], 1088  }
  0x1f   :  { %1936 = vsyncadd [#allocation6], 4294966208 }
  0x20   :  { %1937 = dma.done.wait [#allocation9], 8224  }
  0x21   :  { %1938 = vsyncadd [#allocation9], 4294959072 }
  0x22   :  { %1939 = dma.done.wait [#allocation12], 32  }
  0x23   :  { %1940 = vsyncadd [#allocation12], 4294967264 }
  0x24   :  { %1941 = dma.done.wait [#allocation15], 128  }
  0x25   :  { %1942 = vsyncadd [#allocation15], 4294967168  ;;  %vm226_vm0 = vcmask 261120   ;;  %v1193_v0 = vld [vmem:[#allocation5 + $0x20] sm:$0xf]  ;;  %vm1067_vm1 = vcmask 523264  }
  0x26   :  { %v1600_v1 = vld [vmem:[#allocation5 + $0x2c] sm:$0xf0]  ;;  %v1598_v2 = vld [vmem:[#allocation5 + $0x24] sm:$0xf]  ;;  %v1195_v4 = vld [vmem:[#allocation5 + $0x30] sm:$0xf0] }
  0x27   :  { %v1194_v3 = vor.u32 %v1600_v1, %v1193_v0  ;;  %v1201_v5 = vld [vmem:[#allocation5 + $0x28] sm:$0xf]  ;;  %v1601_v6 = vld [vmem:[#allocation5 + $0x34] sm:$0xf0]  ;;  %v1198_v7 = vor.u32 %v1598_v2, %v1195_v4  ;;  %v1599_v9 = vld [vmem:[#allocation5 + $0x2c] sm:$0xf] }
  0x28   :  { %v1202_v8 = vor.u32 %v1601_v6, %v1201_v5  ;;  %v1203_v10 = vld [vmem:[#allocation5 + $0x38] sm:$0xf0]  ;;  %v1177_v11 = vld [vmem:[#allocation5] sm:$0xf]  ;;  %v1596_v13 = vld [vmem:[#allocation5 + $0xc] sm:$0xf0] }
  0x29   :  { %236 = vmatpush.bf16.msra.mxu0 %v1194_v3  ;;  %v1206_v12 = vor.u32 %v1599_v9, %v1203_v10  ;;  %v1594_v14 = vld [vmem:[#allocation5 + $0x4] sm:$0xf]  ;;  %v1179_v15 = vld [vmem:[#allocation5 + $0x10] sm:$0xf0]  ;;  %249 = vmatpush.bf16.msra.mxu1 %v1198_v7  ;;  %v1178_v16 = vor.u32 %v1596_v13, %v1177_v11  ;;  %v1185_v18 = vld [vmem:[#allocation5 + $0x8] sm:$0xf] }
  0x2a   :  { %262 = vmatpush.bf16.msra.mxu2 %v1202_v8  ;;  %v1182_v17 = vor.u32 %v1594_v14, %v1179_v15  ;;  %v1597_v19 = vld [vmem:[#allocation5 + $0x14] sm:$0xf0]  ;;  %v1595_v20 = vld [vmem:[#allocation5 + $0xc] sm:$0xf]  ;;  %v1187_v22 = vld [vmem:[#allocation5 + $0x18] sm:$0xf0] }
  0x2b   :  { %275 = vmatpush.bf16.msra.mxu3 %v1206_v12  ;;  %v1186_v21 = vor.u32 %v1597_v19, %v1185_v18  ;;  %v167_v23 = vld [vmem:[#allocation2] sm:$0xf]  ;;  %v1269_v24 = vld [vmem:[#allocation8 + $0x70] sm:$0xf]  ;;  %v1190_v25 = vor.u32 %v1595_v20, %v1187_v22  ;;  %v1261_v31 = vld [vmem:[#allocation8 + $0x60] sm:$0xf] }
  0x2c   :  { %v1617_v26 = vld [vmem:[#allocation8 + $0x74] sm:$0xf0]  ;;  %v1333_v27 = vld [vmem:[#allocation8 + $0xf0] sm:$0xf]  ;;  %v1615_v32 = vld [vmem:[#allocation8 + $0x64] sm:$0xf0] }
  0x2d   :  { %v1633_v28 = vld [vmem:[#allocation8 + $0xf4] sm:$0xf0]  ;;  %237 = vmatpush.bf16.msra.mxu0 %v1178_v16  ;;  %v1270_v29 = vor.u32 %v1617_v26, %v1269_v24  ;;  %v1325_v33 = vld [vmem:[#allocation8 + $0xe0] sm:$0xf]  ;;  %250 = vmatpush.bf16.msra.mxu1 %v1182_v17  ;;  %v1631_v34 = vld [vmem:[#allocation8 + $0xe4] sm:$0xf0]  ;;  %v1262_v37 = vor.u32 %v1615_v32, %v1261_v31 }
  0x2e   :  { %v1334_v30 = vor.u32 %v1633_v28, %v1333_v27  ;;  %263 = vmatpush.bf16.msra.mxu2 %v1186_v21  ;;  %v1397_v35 = vld [vmem:[#allocation8 + $0x170] sm:$0xf]  ;;  %v1649_v36 = vld [vmem:[#allocation8 + $0x174] sm:$0xf0]  ;;  %v1326_v42 = vor.u32 %v1631_v34, %v1325_v33  ;;  %v1389_v47 = vld [vmem:[#allocation8 + $0x160] sm:$0xf] }
  0x2f   :  { %276 = vmatpush.bf16.msra.mxu3 %v1190_v25  ;;  %v1398_v38 = vor.u32 %v1649_v36, %v1397_v35  ;;  %v1461_v39 = vld [vmem:[#allocation8 + $0x1f0] sm:$0xf]  ;;  %v1665_v40 = vld [vmem:[#allocation8 + $0x1f4] sm:$0xf0]  ;;  %v1647_v48 = vld [vmem:[#allocation8 + $0x164] sm:$0xf0] }
  0x30   :  { %v1253_v41 = vld [vmem:[#allocation8 + $0x50] sm:$0xf]  ;;  %1207 = vmatmul.msk.bf16.vlgmr.msra.gmra.mxu0 %vm226_vm0, %v167_v23  ;;  %v1462_v43 = vor.u32 %v1665_v40, %v1461_v39  ;;  %v1613_v44 = vld [vmem:[#allocation8 + $0x54] sm:$0xf0]  ;;  %1208 = vmatmul.msk.bf16.vlgmr.msra.gmra.mxu1 %vm226_vm0, %v167_v23  ;;  %v1453_v49 = vld [vmem:[#allocation8 + $0x1e0] sm:$0xf]  ;;  %v1390_v50 = vor.u32 %v1647_v48, %v1389_v47 }
  0x31   :  { %680 = vmatpush.bf16.msrb.mxu0 %v1270_v29  ;;  %693 = vmatpush.bf16.msrb.mxu1 %v1334_v30  ;;  %v1317_v45 = vld [vmem:[#allocation8 + $0xd0] sm:$0xf]  ;;  %v1629_v46 = vld [vmem:[#allocation8 + $0xd4] sm:$0xf0]  ;;  %v1663_v51 = vld [vmem:[#allocation8 + $0x1e4] sm:$0xf0]  ;;  %v1254_v52 = vor.u32 %v1613_v44, %v1253_v41 }
  0x32   :  { %1209 = vmatmul.msk.bf16.vlgmr.msra.gmra.mxu2 %vm226_vm0, %v167_v23  ;;  %1210 = vmatmul.msk.bf16.vlgmr.msra.gmra.mxu3 %vm226_vm0, %v167_v23  ;;  %v1454_v53 = vor.u32 %v1663_v51, %v1453_v49  ;;  %v1245_v54 = vld [vmem:[#allocation8 + $0x40] sm:$0xf]  ;;  %v1611_v55 = vld [vmem:[#allocation8 + $0x44] sm:$0xf0]  ;;  %v1381_v56 = vld [vmem:[#allocation8 + $0x150] sm:$0xf]  ;;  %v1318_v57 = vor.u32 %v1629_v46, %v1317_v45 }
  0x33   :  { %706 = vmatpush.bf16.msrb.mxu2 %v1398_v38  ;;  %719 = vmatpush.bf16.msrb.mxu3 %v1462_v43  ;;  %v1645_v58 = vld [vmem:[#allocation8 + $0x154] sm:$0xf0]  ;;  %v1445_v59 = vld [vmem:[#allocation8 + $0x1d0] sm:$0xf]  ;;  %v1309_v61 = vld [vmem:[#allocation8 + $0xc0] sm:$0xf]  ;;  %v1246_v0 = vor.u32 %v1611_v55, %v1245_v54 }
  0x34   :  { %v1661_v60 = vld [vmem:[#allocation8 + $0x1d4] sm:$0xf0]  ;;  %v1627_v62 = vld [vmem:[#allocation8 + $0xc4] sm:$0xf0]  ;;  %v1382_v63 = vor.u32 %v1645_v58, %v1381_v56  ;;  %v1237_v2 = vld [vmem:[#allocation8 + $0x30] sm:$0xf] }
  0x35   :  { %681 = vmatpush.bf16.msrb.mxu0 %v1262_v37  ;;  %694 = vmatpush.bf16.msrb.mxu1 %v1326_v42  ;;  %v1446_v1 = vor.u32 %v1661_v60, %v1445_v59  ;;  %v1373_v3 = vld [vmem:[#allocation8 + $0x140] sm:$0xf]  ;;  %v1643_v4 = vld [vmem:[#allocation8 + $0x144] sm:$0xf0]  ;;  %v1310_v5 = vor.u32 %v1627_v62, %v1309_v61  ;;  %v1609_v6 = vld [vmem:[#allocation8 + $0x34] sm:$0xf0] }
  0x36   :  { %v1437_v7 = vld [vmem:[#allocation8 + $0x1c0] sm:$0xf]  ;;  %v1659_v8 = vld [vmem:[#allocation8 + $0x1c4] sm:$0xf0]  ;;  %v1301_v9 = vld [vmem:[#allocation8 + $0xb0] sm:$0xf]  ;;  %v1374_v11 = vor.u32 %v1643_v4, %v1373_v3  ;;  %v1238_v12 = vor.u32 %v1609_v6, %v1237_v2 }
  0x37   :  { %707 = vmatpush.bf16.msrb.mxu2 %v1390_v50  ;;  %720 = vmatpush.bf16.msrb.mxu3 %v1454_v53  ;;  %v1625_v10 = vld [vmem:[#allocation8 + $0xb4] sm:$0xf0]  ;;  %v1438_v13 = vor.u32 %v1659_v8, %v1437_v7  ;;  %v1229_v14 = vld [vmem:[#allocation8 + $0x20] sm:$0xf]  ;;  %v1365_v15 = vld [vmem:[#allocation8 + $0x130] sm:$0xf] }
  0x38   :  { %v1641_v16 = vld [vmem:[#allocation8 + $0x134] sm:$0xf0]  ;;  %v1302_v17 = vor.u32 %v1625_v10, %v1301_v9  ;;  %v1607_v18 = vld [vmem:[#allocation8 + $0x24] sm:$0xf0]  ;;  %v1429_v19 = vld [vmem:[#allocation8 + $0x1b0] sm:$0xf] }
  0x39   :  { %682 = vmatpush.bf16.msrb.mxu0 %v1254_v52  ;;  %695 = vmatpush.bf16.msrb.mxu1 %v1318_v57  ;;  %v1657_v20 = vld [vmem:[#allocation8 + $0x1b4] sm:$0xf0]  ;;  %v1293_v21 = vld [vmem:[#allocation8 + $0xa0] sm:$0xf]  ;;  %v1623_v22 = vld [vmem:[#allocation8 + $0xa4] sm:$0xf0]  ;;  %v1366_v23 = vor.u32 %v1641_v16, %v1365_v15  ;;  %v1230_v24 = vor.u32 %v1607_v18, %v1229_v14 }
  0x3a   :  { %v1430_v25 = vor.u32 %v1657_v20, %v1429_v19  ;;  %v1221_v26 = vld [vmem:[#allocation8 + $0x10] sm:$0xf]  ;;  %v1357_v27 = vld [vmem:[#allocation8 + $0x120] sm:$0xf]  ;;  %v1639_v28 = vld [vmem:[#allocation8 + $0x124] sm:$0xf0]  ;;  %v1294_v29 = vor.u32 %v1623_v22, %v1293_v21 }
  0x3b   :  { %708 = vmatpush.bf16.msrb.mxu2 %v1382_v63  ;;  %721 = vmatpush.bf16.msrb.mxu3 %v1446_v1  ;;  %v1605_v30 = vld [vmem:[#allocation8 + $0x14] sm:$0xf0]  ;;  %v1421_v31 = vld [vmem:[#allocation8 + $0x1a0] sm:$0xf]  ;;  %v1655_v32 = vld [vmem:[#allocation8 + $0x1a4] sm:$0xf0]  ;;  %v1358_v35 = vor.u32 %v1639_v28, %v1357_v27 }
  0x3c   :  { %v1285_v33 = vld [vmem:[#allocation8 + $0x90] sm:$0xf]  ;;  %v1621_v34 = vld [vmem:[#allocation8 + $0x94] sm:$0xf0]  ;;  %v1213_v36 = vld [vmem:[#allocation8] sm:$0xf]  ;;  %v1222_v38 = vor.u32 %v1605_v30, %v1221_v26  ;;  %v1422_v39 = vor.u32 %v1655_v32, %v1421_v31 }
  0x3d   :  { %683 = vmatpush.bf16.msrb.mxu0 %v1246_v0  ;;  %696 = vmatpush.bf16.msrb.mxu1 %v1310_v5  ;;  %v1603_v37 = vld [vmem:[#allocation8 + $0x4] sm:$0xf0]  ;;  %v1277_v40 = vld [vmem:[#allocation8 + $0x80] sm:$0xf]  ;;  %v1616_v42 = vld [vmem:[#allocation8 + $0x74] sm:$0xf]  ;;  %v1286_v46 = vor.u32 %v1621_v34, %v1285_v33 }
  0x3e   :  { %v1619_v41 = vld [vmem:[#allocation8 + $0x84] sm:$0xf0]  ;;  %v1271_v43 = vld [vmem:[#allocation8 + $0x78] sm:$0xf0]  ;;  %v1349_v44 = vld [vmem:[#allocation8 + $0x110] sm:$0xf]  ;;  %v1214_v53 = vor.u32 %v1603_v37, %v1213_v36 }
  0x3f   :  { %709 = vmatpush.bf16.msrb.mxu2 %v1374_v11  ;;  %722 = vmatpush.bf16.msrb.mxu3 %v1438_v13  ;;  %v1637_v45 = vld [vmem:[#allocation8 + $0x114] sm:$0xf0]  ;;  %v1632_v47 = vld [vmem:[#allocation8 + $0xf4] sm:$0xf]  ;;  %v1413_v48 = vld [vmem:[#allocation8 + $0x190] sm:$0xf]  ;;  %v1278_v58 = vor.u32 %v1619_v41, %v1277_v40  ;;  %v1274_v59 = vor.u32 %v1616_v42, %v1271_v43 }
  0x40   :  { %v1653_v49 = vld [vmem:[#allocation8 + $0x194] sm:$0xf0]  ;;  %v1335_v50 = vld [vmem:[#allocation8 + $0xf8] sm:$0xf0]  ;;  %v1350_v51 = vor.u32 %v1637_v45, %v1349_v44  ;;  %v1341_v52 = vld [vmem:[#allocation8 + $0x100] sm:$0xf] }
  0x41   :  { %684 = vmatpush.bf16.msrb.mxu0 %v1238_v12  ;;  %697 = vmatpush.bf16.msrb.mxu1 %v1302_v17  ;;  %v1414_v54 = vor.u32 %v1653_v49, %v1413_v48  ;;  %v1614_v55 = vld [vmem:[#allocation8 + $0x64] sm:$0xf]  ;;  %v1635_v56 = vld [vmem:[#allocation8 + $0x104] sm:$0xf0]  ;;  %v1405_v57 = vld [vmem:[#allocation8 + $0x180] sm:$0xf]  ;;  %v1338_v63 = vor.u32 %v1632_v47, %v1335_v50 }
  0x42   :  { %v1651_v60 = vld [vmem:[#allocation8 + $0x184] sm:$0xf0]  ;;  %v1648_v61 = vld [vmem:[#allocation8 + $0x174] sm:$0xf]  ;;  %v1399_v62 = vld [vmem:[#allocation8 + $0x178] sm:$0xf0]  ;;  %v1342_v5 = vor.u32 %v1635_v56, %v1341_v52 }
  0x43   :  { %710 = vmatpush.bf16.msrb.mxu2 %v1366_v23  ;;  %723 = vmatpush.bf16.msrb.mxu3 %v1430_v25  ;;  %v1263_v0 = vld [vmem:[#allocation8 + $0x68] sm:$0xf0]  ;;  %v1664_v1 = vld [vmem:[#allocation8 + $0x1f4] sm:$0xf]  ;;  %v1463_v2 = vld [vmem:[#allocation8 + $0x1f8] sm:$0xf0]  ;;  %v1406_v6 = vor.u32 %v1651_v60, %v1405_v57  ;;  %v1402_v7 = vor.u32 %v1648_v61, %v1399_v62 }
  0x44   :  { %v1630_v3 = vld [vmem:[#allocation8 + $0xe4] sm:$0xf]  ;;  %v1327_v4 = vld [vmem:[#allocation8 + $0xe8] sm:$0xf0]  ;;  %v1266_v8 = vor.u32 %v1614_v55, %v1263_v0  ;;  %v1466_v9 = vor.u32 %v1664_v1, %v1463_v2  ;;  %v1612_v11 = vld [vmem:[#allocation8 + $0x54] sm:$0xf] }
  0x45   :  { %685 = vmatpush.bf16.msrb.mxu0 %v1230_v24  ;;  %698 = vmatpush.bf16.msrb.mxu1 %v1294_v29  ;;  %v1330_v10 = vor.u32 %v1630_v3, %v1327_v4  ;;  %v1255_v12 = vld [vmem:[#allocation8 + $0x58] sm:$0xf0]  ;;  %v1628_v13 = vld [vmem:[#allocation8 + $0xd4] sm:$0xf]  ;;  %v1646_v17 = vld [vmem:[#allocation8 + $0x164] sm:$0xf] }
  0x46   :  { %v1258_v14 = vor.u32 %v1612_v11, %v1255_v12  ;;  %v1319_v15 = vld [vmem:[#allocation8 + $0xd8] sm:$0xf0]  ;;  %v1391_v18 = vld [vmem:[#allocation8 + $0x168] sm:$0xf0]  ;;  %v1662_v20 = vld [vmem:[#allocation8 + $0x1e4] sm:$0xf] }
  0x47   :  { %711 = vmatpush.bf16.msrb.mxu2 %v1358_v35  ;;  %724 = vmatpush.bf16.msrb.mxu3 %v1422_v39  ;;  %v1322_v16 = vor.u32 %v1628_v13, %v1319_v15  ;;  %v1394_v19 = vor.u32 %v1646_v17, %v1391_v18  ;;  %v1455_v21 = vld [vmem:[#allocation8 + $0x1e8] sm:$0xf0]  ;;  %v1610_v23 = vld [vmem:[#allocation8 + $0x44] sm:$0xf]  ;;  %v1644_v29 = vld [vmem:[#allocation8 + $0x154] sm:$0xf] }
  0x48   :  { %v1458_v22 = vor.u32 %v1662_v20, %v1455_v21  ;;  %v1247_v24 = vld [vmem:[#allocation8 + $0x48] sm:$0xf0]  ;;  %v1626_v25 = vld [vmem:[#allocation8 + $0xc4] sm:$0xf]  ;;  %v1383_v30 = vld [vmem:[#allocation8 + $0x158] sm:$0xf0] }
  0x49   :  { %686 = vmatpush.bf16.msrb.mxu0 %v1222_v38  ;;  %699 = vmatpush.bf16.msrb.mxu1 %v1286_v46  ;;  %v1250_v26 = vor.u32 %v1610_v23, %v1247_v24  ;;  %v1311_v27 = vld [vmem:[#allocation8 + $0xc8] sm:$0xf0]  ;;  %v1660_v31 = vld [vmem:[#allocation8 + $0x1d4] sm:$0xf]  ;;  %v1386_v32 = vor.u32 %v1644_v29, %v1383_v30  ;;  %v1447_v33 = vld [vmem:[#allocation8 + $0x1d8] sm:$0xf0] }
  0x4a   :  { %v1314_v28 = vor.u32 %v1626_v25, %v1311_v27  ;;  %v1450_v34 = vor.u32 %v1660_v31, %v1447_v33  ;;  %v1608_v35 = vld [vmem:[#allocation8 + $0x34] sm:$0xf]  ;;  %v1239_v36 = vld [vmem:[#allocation8 + $0x38] sm:$0xf0]  ;;  %v1642_v41 = vld [vmem:[#allocation8 + $0x144] sm:$0xf] }
  0x4b   :  { %712 = vmatpush.bf16.msrb.mxu2 %v1350_v51  ;;  %725 = vmatpush.bf16.msrb.mxu3 %v1414_v54  ;;  %v1242_v37 = vor.u32 %v1608_v35, %v1239_v36  ;;  %v1624_v38 = vld [vmem:[#allocation8 + $0xb4] sm:$0xf]  ;;  %v1303_v39 = vld [vmem:[#allocation8 + $0xb8] sm:$0xf0]  ;;  %v1375_v42 = vld [vmem:[#allocation8 + $0x148] sm:$0xf0] }
  0x4c   :  { %v1306_v40 = vor.u32 %v1624_v38, %v1303_v39  ;;  %v1658_v43 = vld [vmem:[#allocation8 + $0x1c4] sm:$0xf]  ;;  %v1378_v44 = vor.u32 %v1642_v41, %v1375_v42  ;;  %v1439_v45 = vld [vmem:[#allocation8 + $0x1c8] sm:$0xf0]  ;;  %v1367_v54 = vld [vmem:[#allocation8 + $0x138] sm:$0xf0] }
  0x4d   :  { %687 = vmatpush.bf16.msrb.mxu0 %v1214_v53  ;;  %700 = vmatpush.bf16.msrb.mxu1 %v1278_v58  ;;  %v1442_v46 = vor.u32 %v1658_v43, %v1439_v45  ;;  %v1606_v47 = vld [vmem:[#allocation8 + $0x24] sm:$0xf]  ;;  %v1231_v48 = vld [vmem:[#allocation8 + $0x28] sm:$0xf0]  ;;  %v1640_v53 = vld [vmem:[#allocation8 + $0x134] sm:$0xf] }
  0x4e   :  { %v1622_v49 = vld [vmem:[#allocation8 + $0xa4] sm:$0xf]  ;;  %v1234_v50 = vor.u32 %v1606_v47, %v1231_v48  ;;  %v1295_v51 = vld [vmem:[#allocation8 + $0xa8] sm:$0xf0]  ;;  %v1656_v55 = vld [vmem:[#allocation8 + $0x1b4] sm:$0xf]  ;;  %v1370_v56 = vor.u32 %v1640_v53, %v1367_v54 }
  0x4f   :  { %713 = vmatpush.bf16.msrb.mxu2 %v1342_v5  ;;  %726 = vmatpush.bf16.msrb.mxu3 %v1406_v6  ;;  %v1298_v52 = vor.u32 %v1622_v49, %v1295_v51  ;;  %v1431_v57 = vld [vmem:[#allocation8 + $0x1b8] sm:$0xf0]  ;;  %v1620_v61 = vld [vmem:[#allocation8 + $0x94] sm:$0xf]  ;;  %v1638_v0 = vld [vmem:[#allocation8 + $0x124] sm:$0xf] }
  0x50   :  { %v1434_v58 = vor.u32 %v1656_v55, %v1431_v57  ;;  %v1223_v60 = vld [vmem:[#allocation8 + $0x18] sm:$0xf0]  ;;  %v1359_v1 = vld [vmem:[#allocation8 + $0x128] sm:$0xf0]  ;;  %v1654_v4 = vld [vmem:[#allocation8 + $0x1a4] sm:$0xf] }
  0x51   :  { %732 = vmatpush.bf16.msra.mxu0 %v1274_v59  ;;  %745 = vmatpush.bf16.msra.mxu1 %v1338_v63  ;;  %v1604_v59 = vld [vmem:[#allocation8 + $0x14] sm:$0xf]  ;;  %v1287_v63 = vld [vmem:[#allocation8 + $0x98] sm:$0xf0]  ;;  %v1362_v3 = vor.u32 %v1638_v0, %v1359_v1  ;;  %v1423_v5 = vld [vmem:[#allocation8 + $0x1a8] sm:$0xf0] }
  0x52   :  { %v1226_v62 = vor.u32 %v1604_v59, %v1223_v60  ;;  %v1290_v2 = vor.u32 %v1620_v61, %v1287_v63  ;;  %v1602_v6 = vld [vmem:[#allocation8 + $0x4] sm:$0xf]  ;;  %v1636_v13 = vld [vmem:[#allocation8 + $0x114] sm:$0xf]  ;;  %v1415_v17 = vld [vmem:[#allocation8 + $0x198] sm:$0xf0] }
  0x53   :  { %758 = vmatpush.bf16.msra.mxu2 %v1402_v7  ;;  %771 = vmatpush.bf16.msra.mxu3 %v1466_v9  ;;  %v1426_v7 = vor.u32 %v1654_v4, %v1423_v5  ;;  %v1618_v9 = vld [vmem:[#allocation8 + $0x84] sm:$0xf]  ;;  %v1652_v15 = vld [vmem:[#allocation8 + $0x194] sm:$0xf]  ;;  %v1343_v20 = vld [vmem:[#allocation8 + $0x108] sm:$0xf0] }
  0x54   :  { %v1418_v18 = vor.u32 %v1652_v15, %v1415_v17  ;;  %v1650_v21 = vld [vmem:[#allocation8 + $0x184] sm:$0xf]  ;;  %v1407_v23 = vld [vmem:[#allocation8 + $0x188] sm:$0xf0]  ;;  %v176_v24 = vld [vmem:[#allocation7] sm:$0xf] }
  0x55   :  { %733 = vmatpush.bf16.msra.mxu0 %v1266_v8  ;;  %746 = vmatpush.bf16.msra.mxu1 %v1330_v10  ;;  %v1215_v8 = vld [vmem:[#allocation8 + $0x8] sm:$0xf0]  ;;  %v1410_v25 = vor.u32 %v1650_v21, %v1407_v23  ;;  %v179_v27 = vperm.slane %v176_v24, 1  ;;  %v1673_v35 = vld [vmem:[%s2176_s5 + $0x38] sm:$0xff]  ;;  %v1671_v49 = vld [vmem:[%s2176_s5 + $0x28] sm:$0xff]  ;;  %vm1136_vm2 = vcmask 130048  }
  0x56   :  { %v1279_v10 = vld [vmem:[#allocation8 + $0x88] sm:$0xf0]  ;;  %v1218_v11 = vor.u32 %v1602_v6, %v1215_v8  ;;  %v1670_v53 = vld [vmem:[%s2176_s5 + $0x20] sm:$0xff]  ;;  %v1681_v54 = vld [vmem:[%s2176_s5 + $0x78] sm:$0xff]  ;;  %s1959_s2 = smov [#allocation16]   ;;  %s1161_s4 = sshll.u32 %s2186_s15, 4  ;;  %s1162_s4 = int_to_ptr.hbm [resolvable:$true] %s1161_s4 }
  0x57   :  { %759 = vmatpush.bf16.msra.mxu2 %v1394_v19  ;;  %772 = vmatpush.bf16.msra.mxu3 %v1458_v22  ;;  %v1282_v12 = vor.u32 %v1618_v9, %v1279_v10  ;;  %v1634_v19 = vld [vmem:[#allocation8 + $0x104] sm:$0xf]  ;;  %v1672_v43 = vld [vmem:[%s2176_s5 + $0x30] sm:$0xff]  ;;  %v1669_v55 = vld [vmem:[%s2176_s5 + $0x18] sm:$0xff]  ;;  %s1159_s21 = sshll.u32 %s1959_s2, 4  ;;  %s1160_s21 = int_to_ptr.vmem [resolvable:$true] %s1159_s21 }
  0x58   :  { %v1346_v22 = vor.u32 %v1634_v19, %v1343_v20  ;;  %v1680_v57 = vld [vmem:[%s2176_s5 + $0x70] sm:$0xff]  ;;  %v1679_v59 = vld [vmem:[%s2176_s5 + $0x68] sm:$0xff]  ;;  %v1666_v60 = vld [vmem:[%s2176_s5] sm:$0xff] }
  0x59   :  { %734 = vmatpush.bf16.msra.mxu0 %v1258_v14  ;;  %747 = vmatpush.bf16.msra.mxu1 %v1322_v16  ;;  %v1351_v14 = vld [vmem:[#allocation8 + $0x118] sm:$0xf0]  ;;  %v1676_v63 = vld [vmem:[%s2176_s5 + $0x50] sm:$0xff]  ;;  %v1675_v0 = vld [vmem:[%s2176_s5 + $0x48] sm:$0xff] }
  0x5a   :  { %v1354_v16 = vor.u32 %v1636_v13, %v1351_v14  ;;  %v1678_v61 = vld [vmem:[%s2176_s5 + $0x60] sm:$0xff]  ;;  %v354_v1 = vld [vmem:[#allocation10] sm:$0x3]  ;;  %v1688_v9 = vld [vmem:[%s2178_s7 + $0x30] sm:$0xff] }
  0x5b   :  { %760 = vmatpush.bf16.msra.mxu2 %v1386_v32  ;;  %773 = vmatpush.bf16.msra.mxu3 %v1450_v34  ;;  %v180_v34 = vperm.slane %v176_v24, 2  ;;  %v356_v4 = vperm.slane %v354_v1, 0  ;;  %v1674_v5 = vld [vmem:[%s2176_s5 + $0x40] sm:$0xff]  ;;  %v357_v20 = vperm.slane %v354_v1, 1 }
  0x5d   :  { %735 = vmatpush.bf16.msra.mxu0 %v1250_v26  ;;  %748 = vmatpush.bf16.msra.mxu1 %v1314_v28  ;;  %v178_v26 = vperm.slane %v176_v24, 0 }
  0x5f   :  { %761 = vmatpush.bf16.msra.mxu2 %v1378_v44  ;;  %774 = vmatpush.bf16.msra.mxu3 %v1442_v46 }
  0x61   :  { %736 = vmatpush.bf16.msra.mxu0 %v1242_v37  ;;  %749 = vmatpush.bf16.msra.mxu1 %v1306_v40  ;;  %v181_v37 = vperm.slane %v176_v24, 3 }
  0x63   :  { %762 = vmatpush.bf16.msra.mxu2 %v1370_v56  ;;  %775 = vmatpush.bf16.msra.mxu3 %v1434_v58  ;;  %v1668_v56 = vld [vmem:[%s2176_s5 + $0x10] sm:$0xff]  ;;  %v1667_v58 = vld [vmem:[%s2176_s5 + $0x8] sm:$0xff] }
  0x65   :  { %737 = vmatpush.bf16.msra.mxu0 %v1234_v50  ;;  %750 = vmatpush.bf16.msra.mxu1 %v1298_v52 }
  0x67   :  { %763 = vmatpush.bf16.msra.mxu2 %v1362_v3  ;;  %776 = vmatpush.bf16.msra.mxu3 %v1426_v7  ;;  %v1689_v7 = vld [vmem:[%s2178_s7 + $0x38] sm:$0xff] }
  0x69   :  { %738 = vmatpush.bf16.msra.mxu0 %v1226_v62  ;;  %751 = vmatpush.bf16.msra.mxu1 %v1290_v2  ;;  %v1677_v62 = vld [vmem:[%s2176_s5 + $0x58] sm:$0xff] }
  0x6b   :  { %764 = vmatpush.bf16.msra.mxu2 %v1354_v16  ;;  %777 = vmatpush.bf16.msra.mxu3 %v1418_v18 }
  0x6d   :  { %739 = vmatpush.bf16.msra.mxu0 %v1218_v11  ;;  %752 = vmatpush.bf16.msra.mxu1 %v1282_v12 }
  0x6f   :  { %765 = vmatpush.bf16.msra.mxu2 %v1346_v22  ;;  %778 = vmatpush.bf16.msra.mxu3 %v1410_v25 }
  0xad   :  { %v239_v28 = vpop.f32.mrf.mxu0  ;;  %v252_v30 = vpop.f32.mrf.mxu1 }
  0xae   :  { %v240_v29 = vadd.f32 %v239_v28, %v178_v26  ;;  %v253_v31 = vadd.f32 %v252_v30, %v179_v27 }
  0xb0   :  { %v282_v32 = vmax.f32 %v240_v29, 0.0  ;;  %v283_v33 = vmax.f32 %v253_v31, 0.0 }
  0xb2   :  { %v286_v36 = vpack.c.bf16 %v282_v32, %v282_v32  ;;  %v287_v38 = vpack.c.bf16 %v283_v33, %v283_v33 }
  0xb4   :  { %688 = vmatmul.bf16.vlgmr.msrb.gmra.mxu0 %v286_v36  ;;  %701 = vmatmul.bf16.vlgmr.msrb.gmra.mxu1 %v287_v38 }
  0xb5   :  { %v265_v39 = vpop.f32.mrf.mxu2  ;;  %v278_v41 = vpop.f32.mrf.mxu3  ;;  %920 = vmatpush.bf16.msrb.mxu0 %v1673_v35  ;;  %933 = vmatpush.bf16.msrb.mxu1 %v1681_v54  ;;  %v1687_v35 = vld [vmem:[%s2178_s7 + $0x28] sm:$0xff] }
  0xb6   :  { %v266_v40 = vadd.f32 %v265_v39, %v180_v34  ;;  %v241_v42 = vpop.f32.mrf.mxu0  ;;  %v279_v44 = vadd.f32 %v278_v41, %v181_v37  ;;  %v254_v45 = vpop.f32.mrf.mxu1  ;;  %v1685_v37 = vld [vmem:[%s2178_s7 + $0x18] sm:$0xff]  ;;  %v1683_v39 = vld [vmem:[%s2178_s7 + $0x8] sm:$0xff] }
  0xb7   :  { %v1693_v41 = vld [vmem:[%s2180_s9 + $0x18] sm:$0xff]  ;;  %v1692_v42 = vld [vmem:[%s2180_s9 + $0x10] sm:$0xff]  ;;  %v1695_v54 = vld [vmem:[%s2182_s11 + $0x8] sm:$0xff] }
  0xb8   :  { %v284_v46 = vmax.f32 %v266_v40, 0.0  ;;  %v285_v47 = vmax.f32 %v279_v44, 0.0  ;;  %v1682_v40 = vld [vmem:[%s2178_s7] sm:$0xff] }
  0xb9   :  { %921 = vmatpush.bf16.msrb.mxu0 %v1672_v43  ;;  %934 = vmatpush.bf16.msrb.mxu1 %v1680_v57  ;;  %v1691_v43 = vld [vmem:[%s2180_s9 + $0x8] sm:$0xff] }
  0xba   :  { %v288_v48 = vpack.c.bf16 %v284_v46, %v284_v46  ;;  %v289_v50 = vpack.c.bf16 %v285_v47, %v285_v47  ;;  %v1712_v46 = vld [vmem:[#allocation11] ss:$0 sm:$0xff] }
  0xbc   :  { %714 = vmatmul.bf16.vlgmr.msrb.gmra.mxu2 %v288_v48  ;;  %727 = vmatmul.bf16.vlgmr.msrb.gmra.mxu3 %v289_v50 }
  0xbd   :  { %v267_v51 = vpop.f32.mrf.mxu2  ;;  %v280_v52 = vpop.f32.mrf.mxu3  ;;  %922 = vmatpush.bf16.msrb.mxu0 %v1671_v49  ;;  %935 = vmatpush.bf16.msrb.mxu1 %v1679_v59 }
  0xbe   :  { %1016 = vmatpush.bf16.msrb.mxu2 %v1689_v7  ;;  %1075 = vmatpush.bf16.msrb.mxu3 %v1693_v41 }
  0xc1   :  { %923 = vmatpush.bf16.msrb.mxu0 %v1670_v53  ;;  %936 = vmatpush.bf16.msrb.mxu1 %v1678_v61  ;;  %v1690_v53 = vld [vmem:[%s2180_s9] sm:$0xff] }
  0xc2   :  { %1017 = vmatpush.bf16.msrb.mxu2 %v1688_v9  ;;  %1076 = vmatpush.bf16.msrb.mxu3 %v1692_v42 }
  0xc4   :  { %740 = vmatmul.bf16.vlgmr.msra.gmra.mxu0 %v286_v36  ;;  %753 = vmatmul.bf16.vlgmr.msra.gmra.mxu1 %v287_v38  ;;  %v1686_v36 = vld [vmem:[%s2178_s7 + $0x20] sm:$0xff]  ;;  %v1684_v38 = vld [vmem:[%s2178_s7 + $0x10] sm:$0xff] }
  0xc5   :  { %924 = vmatpush.bf16.msrb.mxu0 %v1669_v55  ;;  %937 = vmatpush.bf16.msrb.mxu1 %v1677_v62  ;;  %v1694_v55 = vld [vmem:[%s2182_s11] sm:$0xff]  ;;  %v1696_v62 = vld [vmem:[#allocation14] sm:$0xff] }
  0xc6   :  { %1018 = vmatpush.bf16.msrb.mxu2 %v1687_v35  ;;  %1077 = vmatpush.bf16.msrb.mxu3 %v1691_v43 }
  0xc9   :  { %925 = vmatpush.bf16.msrb.mxu0 %v1668_v56  ;;  %938 = vmatpush.bf16.msrb.mxu1 %v1676_v63  ;;  %v1713_v56 = vld [vmem:[#allocation13] ss:$0 sm:$0xff]  ;;  %v1714_v63 = vld [vmem:[%s2181_s10] ss:$0 sm:$0xff] }
  0xca   :  { %1019 = vmatpush.bf16.msrb.mxu2 %v1686_v36  ;;  %1078 = vmatpush.bf16.msrb.mxu3 %v1690_v53 }
  0xcc   :  { %766 = vmatmul.bf16.vlgmr.msra.gmra.mxu2 %v288_v48  ;;  %779 = vmatmul.bf16.vlgmr.msra.gmra.mxu3 %v289_v50 }
  0xcd   :  { %926 = vmatpush.bf16.msrb.mxu0 %v1667_v58  ;;  %939 = vmatpush.bf16.msrb.mxu1 %v1675_v0 }
  0xce   :  { %1020 = vmatpush.bf16.msrb.mxu2 %v1685_v37  ;;  %1115 = vmatpush.bf16.msra.mxu3 %v1695_v54 }
  0xd1   :  { %927 = vmatpush.bf16.msrb.mxu0 %v1666_v60  ;;  %940 = vmatpush.bf16.msrb.mxu1 %v1674_v5  ;;  %v1715_v5 = vld [vmem:[%s2183_s12] ss:$0 sm:$0xff] }
  0xd2   :  { %1021 = vmatpush.bf16.msrb.mxu2 %v1684_v38  ;;  %1116 = vmatpush.bf16.msra.mxu3 %v1694_v55 }
  0xd5   :  { %1147 = vmatpush.bf16.msra.mxu0 %v1696_v62 }
  0xd6   :  { %1022 = vmatpush.bf16.msrb.mxu2 %v1683_v39 }
  0xda   :  { %1023 = vmatpush.bf16.msrb.mxu2 %v1682_v40 }
 0x131   :  { %v689_v2 = vpop.f32.mrf.mxu0  ;;  %v702_v3 = vpop.f32.mrf.mxu1 }
 0x132   :  { %v690_v6 = vadd.f32 %v689_v2, %v356_v4 }
 0x134   :  { %v703_v11 = vadd.f32 %v702_v3, %v690_v6 }
 0x139   :  { %v691_v8 = vpop.f32.mrf.mxu0  ;;  %v704_v10 = vpop.f32.mrf.mxu1 }
 0x13f   :  { %v715_v12 = vpop.f32.mrf.mxu2  ;;  %v728_v14 = vpop.f32.mrf.mxu3 }
 0x140   :  { %v716_v13 = vadd.f32 %v715_v12, %v703_v11  ;;  %v1716_v11 = vld [vmem:[%s2185_s14] ss:$0 sm:$0xff] }
 0x141   :  { %v741_v16 = vpop.f32.mrf.mxu0  ;;  %v754_v17 = vpop.f32.mrf.mxu1 }
 0x142   :  { %v729_v15 = vadd.f32 %v728_v14, %v716_v13  ;;  %v742_v23 = vadd.f32 %v741_v16, %v357_v20 }
 0x144   :  { %v784_v18 = vmax.f32 %v729_v15, 0.0  ;;  %v755_v26 = vadd.f32 %v754_v17, %v742_v23 }
 0x146   :  { %v786_v19 = vpack.c.bf16 %v784_v18, %v784_v18 }
 0x147   :  { %v717_v21 = vpop.f32.mrf.mxu2  ;;  %v730_v22 = vpop.f32.mrf.mxu3 }
 0x148   :  { %928 = vmatmul.bf16.vlgmr.msrb.gmra.mxu0 %v786_v19 }
 0x149   :  { %v743_v24 = vpop.f32.mrf.mxu0  ;;  %v756_v25 = vpop.f32.mrf.mxu1 }
 0x14f   :  { %v767_v27 = vpop.f32.mrf.mxu2  ;;  %v780_v29 = vpop.f32.mrf.mxu3 }
 0x150   :  { %v768_v28 = vadd.f32 %v767_v27, %v755_v26 }
 0x152   :  { %v781_v30 = vadd.f32 %v780_v29, %v768_v28 }
 0x154   :  { %v785_v31 = vmax.f32 %v781_v30, 0.0 }
 0x156   :  { %v787_v32 = vpack.c.bf16 %v785_v31, %v785_v31 }
 0x157   :  { %v769_v33 = vpop.f32.mrf.mxu2  ;;  %v782_v34 = vpop.f32.mrf.mxu3 }
 0x158   :  { %941 = vmatmul.bf16.vlgmr.msrb.gmra.mxu1 %v787_v32 }
 0x1c5   :  { %v929_v44 = vpop.f32.mrf.mxu0 }
 0x1c6   :  { %v930_v47 = vadd.f32 %v1712_v46, %v929_v44 }
 0x1cd   :  { %v931_v45 = vpop.f32.mrf.mxu0 }
 0x1d5   :  { %v942_v48 = vpop.f32.mrf.mxu1 }
 0x1d6   :  { %v943_v49 = vadd.f32 %v942_v48, %v930_v47 }
 0x1d8   :  { %v946_v50 = vmax.f32 %v943_v49, 0.0 }
 0x1da   :  { %v947_v51 = vpack.c.bf16 %v946_v50, %v946_v50 }
 0x1dc   :  { %1024 = vmatmul.bf16.vlgmr.msrb.gmra.mxu2 %v947_v51 }
 0x1dd   :  { %v944_v52 = vpop.f32.mrf.mxu1 }
 0x25f   :  { %v1025_v57 = vpop.f32.mrf.mxu2 }
 0x260   :  { %v1026_v58 = vadd.f32 %v1713_v56, %v1025_v57 }
 0x262   :  { %v1029_v59 = vmax.f32 %v1026_v58, 0.0 }
 0x264   :  { %v1030_v60 = vpack.c.bf16 %v1029_v59, %v1029_v59 }
 0x266   :  { %1579 = vmatmul.msk.bf16.vlgmr.msrb.gmra.mxu3 %vm1067_vm1, %v1030_v60 }
 0x267   :  { %v1027_v61 = vpop.f32.mrf.mxu2 }
 0x2e9   :  { %v1080_v0 = vpop.f32.mrf.mxu3 }
 0x2ea   :  { %v1081_v1 = vadd.f32 %v1714_v63, %v1080_v0 }
 0x2ec   :  { %v1084_v2 = vmax.f32 %v1081_v1, 0.0 }
 0x2ee   :  { %v1085_v3 = vpack.c.bf16 %v1084_v2, %v1084_v2 }
 0x2f0   :  { %1588 = vmatmul.msk.bf16.vlgmr.msra.gmra.mxu3 %vm226_vm0, %v1085_v3 }
 0x2f1   :  { %v1082_v4 = vpop.f32.mrf.mxu3 }
 0x373   :  { %v1118_v6 = vpop.f32.mrf.mxu3 }
 0x374   :  { %v1119_v7 = vadd.f32 %v1715_v5, %v1118_v6 }
 0x376   :  { %v1122_v8 = vmax.f32 %v1119_v7, 0.0 }
 0x378   :  { %v1123_v9 = vpack.c.bf16 %v1122_v8, %v1122_v8 }
 0x37a   :  { %1593 = vmatmul.msk.bf16.vlgmr.msra.gmra.mxu0 %vm1136_vm2, %v1123_v9 }
 0x37b   :  { %v1120_v10 = vpop.f32.mrf.mxu3 }
 0x3f7   :  { %v1149_v12 = vpop.f32.mrf.mxu0 }
 0x3f8   :  { %v1150_v13 = vadd.f32 %v1716_v11, %v1149_v12 }
 0x3fa   :  { %1153 = vst [vmem:[#allocation16] sm:$0xff] %v1150_v13 }
 0x3fb   :  { %1164 = dma.vmem_to_hbm [thread:$0]  %s1160_s21, 128, %s1162_s4, [#allocation4]  }
 0x3ff   :  { %v1151_v14 = vpop.f32.mrf.mxu0 }
 0x400   :  { %1943 = dma.done.wait [#allocation4], 128  }
 0x401   :  { %1944 = vsyncadd [#allocation4], 4294967168 }
 0x402   :  { %1169 = vsyncpa [#allocation3], 1 }
 0x403   :  { %1170 = vsyncpa [#allocation6], 1 }
 0x404   :  { %1171 = vsyncpa [#allocation9], 1 }
 0x405   :  { %1172 = vsyncpa [#allocation12], 1 }
 0x406   :  { %1173 = vsyncpa [#allocation15], 1 }
 0x407   :  { %1174 = vsyncpa [#allocation4], 1 }

</bundles_post_ra>
